<compile_context>
chip_gen: v7x
topology: tpu7x:2x2x1
jax: 0.10.0
libtpu: 0.0.40
codegen_flags: <defaults>
</compile_context>

<pallas_src>
import jax
import jax.numpy as jnp
from jax.experimental import pallas as pl
from jax.experimental.pallas import tpu as pltpu

# ---------------- model sizes (small char-VAE) --------------------------------
B = 2        # batch
S = 8        # sequence length
V = 16       # vocab size (one-hot)
H = 32       # hidden width
Z = 8        # latent dim
D_IN = S * V # 128
LANES = 128
assert D_IN <= LANES and H <= LANES and V <= LANES and 3 * Z <= LANES


def _align8(n):
    return (n + 7) // 8 * 8


# packed PARAMETER slab row offsets (8-row aligned; every block starts at lane 0)
P_EB   = 0                         # row 0: enc hidden bias[:H]; row 1: [bmu|blv][:2Z]
P_DB   = P_EB + 8                  # row 8: dec hidden bias[:H]; row 9: out bias[:V]
P_EW1  = P_DB + 8                  # (D_IN, :H)   encoder hidden weight
P_EWH  = P_EW1 + _align8(D_IN)     # (H,  :2Z)    merged [wmu|wlv] head
P_DW1Z = P_EWH + _align8(H)        # (Z,  :H)     decoder z -> hidden
P_DW1X = P_DW1Z + _align8(Z)       # (V,  :H)     decoder token -> hidden
P_DW2  = P_DW1X + _align8(V)       # (H,  :V)     decoder hidden -> logits
P_ROWS = P_DW2 + _align8(H)

# packed ACTIVATION slab row offsets
A_X    = 0                         # (B,   :D_IN) flattened one-hot sequence
A_XP   = A_X + _align8(B)          # (B*S, :V)    per-position one-hot
A_EPS  = A_XP + _align8(B * S)     # (B,   :Z)    reparameterization noise
A_ROWS = A_EPS + _align8(B)

_VMEM = pl.BlockSpec(memory_space=pltpu.MemorySpace.VMEM)
_SMEM = pl.BlockSpec(memory_space=pltpu.MemorySpace.SMEM)


# ---------------- fused Pallas kernel -----------------------------------------
def vae_kernel(inv_t_ref, act_ref, par_ref, out_ref):
    # ---- carve packed slabs: static, tile-aligned ref slices ----
    x_flat = act_ref[A_X:A_X + B, :D_IN]               # (B, D_IN)
    x_pos  = act_ref[A_XP:A_XP + B * S, :V]            # (B*S, V)
    eps    = act_ref[A_EPS:A_EPS + B, :Z]              # (B, Z)

    eb1 = par_ref[P_EB:P_EB + 1, :]                    # (1, 128) enc hidden bias (lanes>=H are 0)
    ebh = par_ref[P_EB + 1:P_EB + 2, :]                # (1, 128) [bmu|blv]
    db1 = par_ref[P_DB:P_DB + 1, :]                    # (1, 128) dec hidden bias
    db2 = par_ref[P_DB + 1:P_DB + 2, :]                # (1, 128) dec output bias
    enc_w1  = par_ref[P_EW1:P_EW1 + D_IN, :]           # (D_IN, 128) lanes>=H zero
    enc_wh  = par_ref[P_EWH:P_EWH + H, :]              # (H, 128)    lanes>=2Z zero
    dec_w1z = par_ref[P_DW1Z:P_DW1Z + Z, :]            # (Z, 128)    lanes>=H zero
    dec_w1x = par_ref[P_DW1X:P_DW1X + V, :]            # (V, 128)    lanes>=H zero
    dec_w2  = par_ref[P_DW2:P_DW2 + H, :]              # (H, 128)    lanes>=V zero

    # ---------------- encoder ----------------
    h = jnp.maximum(jnp.dot(x_flat, enc_w1,
                            preferred_element_type=jnp.float32) + eb1, 0.0)   # (B,128)
    heads = jnp.dot(h[:, :H], enc_wh,
                    preferred_element_type=jnp.float32) + ebh                 # (B,128) [mu|logvar|0..]
    mu = heads[:, :Z]
    logvar = heads[:, Z:2 * Z]
    # reparameterization: z = mu + eps * exp(0.5 * logvar)
    z = mu + eps * jnp.exp(0.5 * logvar)                                      # (B, Z)

    # ---------------- decoder (teacher forced, per position) ----------------
    hz = jnp.dot(z, dec_w1z, preferred_element_type=jnp.float32)              # (B, 128)
    hx = jnp.dot(x_pos, dec_w1x, preferred_element_type=jnp.float32)          # (B*S, 128), off crit path
    # broadcast hz over the S positions: sublane broadcast + leading-dim reshape
    # (no MXU op on the serial chain, scales O(B*S*H) not O(B^2*S)).
    hz_b = jnp.broadcast_to(hz[:, None, :], (B, S, LANES)).reshape(B * S, LANES)
    hd = jnp.maximum(hx + hz_b + db1, 0.0)                                    # (B*S, 128)
    logits = jnp.dot(hd[:, :H], dec_w2,
                     preferred_element_type=jnp.float32) + db2                # (B*S, 128), lanes>=V zero

    # temperature-scaled softmax over the V vocab lanes (padded lanes masked to 0).
    # inv_t folded into the exponent: equals softmax(logits/T) for T > 0.
    inv_t = inv_t_ref[0]
    lane = jax.lax.broadcasted_iota(jnp.int32, (B * S, LANES), 1)
    ml = jnp.where(lane < V, logits, jnp.float32(-1e30))
    m = jnp.max(ml, axis=-1, keepdims=True)
    e = jnp.exp((ml - m) * inv_t)                       # masked lanes underflow to exactly 0
    d = jnp.sum(e, axis=-1, keepdims=True)
    r = pl.reciprocal(d, approx=True)                   # EUP slot (otherwise idle)
    r = r * (2.0 - d * r)                               # one Newton step -> ~f32 accuracy
    out_ref[0:B * S, :] = e * r                         # full-lane (unmasked) store

    # stats rows: [mu | logvar | z | 0 ...] -> one lane-dense store
    pad = jnp.zeros((B, LANES - 3 * Z), jnp.float32)
    out_ref[B * S:B * S + B, :] = jnp.concatenate([mu, logvar, z, pad], axis=-1)


# ---------------- wrapper ------------------------------------------------------
def pack_params(p):
    """Pack all weights/biases into one lane-padded (P_ROWS, 128) f32 slab (done once)."""
    slab = jnp.zeros((P_ROWS, LANES), jnp.float32)
    slab = slab.at[P_EB, :H].set(p["enc_b1"])
    slab = slab.at[P_EB + 1, :Z].set(p["enc_bmu"])
    slab = slab.at[P_EB + 1, Z:2 * Z].set(p["enc_blv"])
    slab = slab.at[P_DB, :H].set(p["dec_b1"])
    slab = slab.at[P_DB + 1, :V].set(p["dec_b2"])
    slab = slab.at[P_EW1:P_EW1 + D_IN, :H].set(p["enc_w1"])
    slab = slab.at[P_EWH:P_EWH + H, :Z].set(p["enc_wmu"])
    slab = slab.at[P_EWH:P_EWH + H, Z:2 * Z].set(p["enc_wlv"])
    slab = slab.at[P_DW1Z:P_DW1Z + Z, :H].set(p["dec_w1z"])
    slab = slab.at[P_DW1X:P_DW1X + V, :H].set(p["dec_w1x"])
    slab = slab.at[P_DW2:P_DW2 + H, :V].set(p["dec_w2"])
    return slab


def vae_forward(inputs, param_slab, eps, temperature=1.0):
    """inputs: (B, S, V) one-hot. param_slab: pre-packed weights. Returns (mu, logvar, z, decoded)."""
    if isinstance(temperature, (int, float)):
        assert temperature > 0.0, "temperature must be > 0"

    # pack the per-call activations into one small lane-padded slab
    x_flat = inputs.reshape(B, D_IN).astype(jnp.float32)
    x_pos = inputs.reshape(B * S, V).astype(jnp.float32)
    act = jnp.zeros((A_ROWS, LANES), jnp.float32)
    act = act.at[A_X:A_X + B, :D_IN].set(x_flat)
    act = act.at[A_XP:A_XP + B * S, :V].set(x_pos)
    act = act.at[A_EPS:A_EPS + B, :Z].set(eps.astype(jnp.float32))

    inv_t = jnp.reshape(1.0 / jnp.asarray(temperature, jnp.float32), (1,))

    out = pl.pallas_call(
        vae_kernel,
        out_shape=jax.ShapeDtypeStruct((B * S + B, LANES), jnp.float32),
        in_specs=[_SMEM, _VMEM, _VMEM],
        out_specs=_VMEM,
    )(inv_t, act, param_slab)

    decoded = out[:B * S, :V].reshape(B, S, V)
    stats = out[B * S:B * S + B, :]
    mu = stats[:, :Z]
    logvar = stats[:, Z:2 * Z]
    z = stats[:, 2 * Z:3 * Z]
    return mu, logvar, z, decoded


# ---------------- pure-JAX reference (for validation) --------------------------
def vae_reference(inputs, params, eps, temperature=1.0):
    x = inputs.reshape(B, D_IN).astype(jnp.float32)
    h = jax.nn.relu(x @ params["enc_w1"] + params["enc_b1"])
    mu = h @ params["enc_wmu"] + params["enc_bmu"]
    logvar = h @ params["enc_wlv"] + params["enc_blv"]
    z = mu + eps * jnp.exp(0.5 * logvar)
    xp = inputs.reshape(B * S, V).astype(jnp.float32)
    hz = jnp.repeat(z @ params["dec_w1z"], S, axis=0)
    hd = jax.nn.relu(xp @ params["dec_w1x"] + hz + params["dec_b1"])
    logits = (hd @ params["dec_w2"] + params["dec_b2"]) / temperature
    decoded = jax.nn.softmax(logits, axis=-1).reshape(B, S, V)
    return mu, logvar, z, decoded


# ---------------- deterministic parameter init ----------------------------------
def init_params(key):
    ks = jax.random.split(key, 11)
    s = 0.05
    return {
        "enc_w1":  s * jax.random.normal(ks[0], (D_IN, H), jnp.float32),
        "enc_wmu": s * jax.random.normal(ks[1], (H, Z), jnp.float32),
        "enc_wlv": s * jax.random.normal(ks[2], (H, Z), jnp.float32),
        "enc_b1":  s * jax.random.normal(ks[3], (H,), jnp.float32),
        "enc_bmu": s * jax.random.normal(ks[4], (Z,), jnp.float32),
        "enc_blv": s * jax.random.normal(ks[5], (Z,), jnp.float32),
        "dec_w1z": s * jax.random.normal(ks[6], (Z, H), jnp.float32),
        "dec_w1x": s * jax.random.normal(ks[7], (V, H), jnp.float32),
        "dec_w2":  s * jax.random.normal(ks[8], (H, V), jnp.float32),
        "dec_b1":  s * jax.random.normal(ks[9], (H,), jnp.float32),
        "dec_b2":  s * jax.random.normal(ks[10], (V,), jnp.float32),
    }


if __name__ == "__main__":
    key = jax.random.PRNGKey(0)
    k_param, k_tok, k_eps = jax.random.split(key, 3)

    params = init_params(k_param)
    param_slab = pack_params(params)            # packed once, reused every call

    # deterministic one-hot character sequences (B, S, V)
    tok = jax.random.randint(k_tok, (B, S), 0, V)
    inputs = jax.nn.one_hot(tok, V, dtype=jnp.float32)

    # reparameterization noise (fixed, deterministic)
    eps = jax.random.normal(k_eps, (B, Z), jnp.float32)

    fwd = jax.jit(vae_forward)

    for temp in (1.0, 0.7):
        mu, logvar, z, decoded = fwd(inputs, param_slab, eps, temp)
        jax.block_until_ready((mu, logvar, z, decoded))

        # shape / probability sanity checks
        assert mu.shape == (B, Z) and logvar.shape == (B, Z) and z.shape == (B, Z)
        assert decoded.shape == (B, S, V)
        assert jnp.allclose(jnp.sum(decoded, axis=-1), 1.0, atol=1e-4)

        # numerical check against a pure-JAX reference
        rmu, rlogvar, rz, rdec = vae_reference(inputs, params, eps, temperature=temp)
        assert jnp.allclose(mu, rmu, atol=1e-5)
        assert jnp.allclose(logvar, rlogvar, atol=1e-5)
        assert jnp.allclose(z, rz, atol=1e-5)
        assert jnp.allclose(decoded, rdec, atol=1e-4)

    print("KERNEL_OK")
</pallas_src>

<mosaic_0001>
module attributes {stable_mosaic.version = 11 : i64} {
  func.func @vae_kernel(%arg0: memref<1xf32, #tpu.memory_space<smem>>, %arg1: memref<32x128xf32, #tpu.memory_space<vmem>>, %arg2: memref<232x128xf32, #tpu.memory_space<vmem>>, %arg3: memref<18x128xf32, #tpu.memory_space<vmem>>) attributes {dimension_semantics = [], scalar_prefetch = 0 : i64, scratch_operands = 0 : i64, tpu.core_type = #tpu.core_type<tc>} {
    %c0 = arith.constant 0 : index
    %c0_0 = arith.constant 0 : index
    %0 = vector.load %arg1[%c0, %c0_0] : memref<32x128xf32, #tpu.memory_space<vmem>>, vector<2x128xf32>
    %c8 = arith.constant 8 : index
    %c0_1 = arith.constant 0 : index
    %1 = vector.load %arg1[%c8, %c0_1] : memref<32x128xf32, #tpu.memory_space<vmem>>, vector<16x16xf32>
    %c24 = arith.constant 24 : index
    %c0_2 = arith.constant 0 : index
    %2 = vector.load %arg1[%c24, %c0_2] : memref<32x128xf32, #tpu.memory_space<vmem>>, vector<2x8xf32>
    %c0_3 = arith.constant 0 : index
    %c0_4 = arith.constant 0 : index
    %3 = vector.load %arg2[%c0_3, %c0_4] : memref<232x128xf32, #tpu.memory_space<vmem>>, vector<1x128xf32>
    %c1 = arith.constant 1 : index
    %c0_5 = arith.constant 0 : index
    %4 = vector.load %arg2[%c1, %c0_5] : memref<232x128xf32, #tpu.memory_space<vmem>>, vector<1x128xf32>
    %c8_6 = arith.constant 8 : index
    %c0_7 = arith.constant 0 : index
    %5 = vector.load %arg2[%c8_6, %c0_7] : memref<232x128xf32, #tpu.memory_space<vmem>>, vector<1x128xf32>
    %c9 = arith.constant 9 : index
    %c0_8 = arith.constant 0 : index
    %6 = vector.load %arg2[%c9, %c0_8] : memref<232x128xf32, #tpu.memory_space<vmem>>, vector<1x128xf32>
    %c16 = arith.constant 16 : index
    %c0_9 = arith.constant 0 : index
    %7 = vector.load %arg2[%c16, %c0_9] : memref<232x128xf32, #tpu.memory_space<vmem>>, vector<128x128xf32>
    %c144 = arith.constant 144 : index
    %c0_10 = arith.constant 0 : index
    %8 = vector.load %arg2[%c144, %c0_10] : memref<232x128xf32, #tpu.memory_space<vmem>>, vector<32x128xf32>
    %c176 = arith.constant 176 : index
    %c0_11 = arith.constant 0 : index
    %9 = vector.load %arg2[%c176, %c0_11] : memref<232x128xf32, #tpu.memory_space<vmem>>, vector<8x128xf32>
    %c184 = arith.constant 184 : index
    %c0_12 = arith.constant 0 : index
    %10 = vector.load %arg2[%c184, %c0_12] : memref<232x128xf32, #tpu.memory_space<vmem>>, vector<16x128xf32>
    %c200 = arith.constant 200 : index
    %c0_13 = arith.constant 0 : index
    %11 = vector.load %arg2[%c200, %c0_13] : memref<232x128xf32, #tpu.memory_space<vmem>>, vector<32x128xf32>
    %cst = arith.constant dense<0.000000e+00> : vector<2x128xf32>
    %12 = tpu.matmul %0, %7, %cst {dimension_numbers = #tpu.dot_dimension_numbers<[1], [0], [0], [1], [0, 0, 1, 1], [], []>} : vector<2x128xf32>, vector<128x128xf32>, vector<2x128xf32> -> vector<2x128xf32>
    %13 = vector.broadcast %3 : vector<1x128xf32> to vector<2x128xf32>
    %14 = arith.addf %12, %13 : vector<2x128xf32>
    %cst_14 = arith.constant 0.000000e+00 : f32
    %15 = vector.broadcast %cst_14 : f32 to vector<2x128xf32>
    %16 = arith.maximumf %14, %15 : vector<2x128xf32>
    %17 = vector.extract_strided_slice %16 {offsets = [0, 0], sizes = [2, 32], strides = [1, 1]} : vector<2x128xf32> to vector<2x32xf32>
    %cst_15 = arith.constant dense<0.000000e+00> : vector<2x128xf32>
    %18 = tpu.matmul %17, %8, %cst_15 {dimension_numbers = #tpu.dot_dimension_numbers<[1], [0], [0], [1], [0, 0, 1, 1], [], []>} : vector<2x32xf32>, vector<32x128xf32>, vector<2x128xf32> -> vector<2x128xf32>
    %19 = vector.broadcast %4 : vector<1x128xf32> to vector<2x128xf32>
    %20 = arith.addf %18, %19 : vector<2x128xf32>
    %21 = vector.extract_strided_slice %20 {offsets = [0, 0], sizes = [2, 8], strides = [1, 1]} : vector<2x128xf32> to vector<2x8xf32>
    %22 = vector.extract_strided_slice %20 {offsets = [0, 8], sizes = [2, 8], strides = [1, 1]} : vector<2x128xf32> to vector<2x8xf32>
    %cst_16 = arith.constant 5.000000e-01 : f32
    %23 = vector.broadcast %cst_16 : f32 to vector<2x8xf32>
    %24 = arith.mulf %23, %22 : vector<2x8xf32>
    %25 = math.exp %24 : vector<2x8xf32>
    %26 = arith.mulf %2, %25 : vector<2x8xf32>
    %27 = arith.addf %21, %26 : vector<2x8xf32>
    %cst_17 = arith.constant dense<0.000000e+00> : vector<2x128xf32>
    %28 = tpu.matmul %27, %9, %cst_17 {dimension_numbers = #tpu.dot_dimension_numbers<[1], [0], [0], [1], [0, 0, 1, 1], [], []>} : vector<2x8xf32>, vector<8x128xf32>, vector<2x128xf32> -> vector<2x128xf32>
    %cst_18 = arith.constant dense<0.000000e+00> : vector<16x128xf32>
    %29 = tpu.matmul %1, %10, %cst_18 {dimension_numbers = #tpu.dot_dimension_numbers<[1], [0], [0], [1], [0, 0, 1, 1], [], []>} : vector<16x16xf32>, vector<16x128xf32>, vector<16x128xf32> -> vector<16x128xf32>
    %30 = vector.shape_cast %28 : vector<2x128xf32> to vector<2x1x128xf32>
    %31 = vector.shape_cast %30 : vector<2x1x128xf32> to vector<2x1x128xf32>
    %32 = vector.broadcast %31 : vector<2x1x128xf32> to vector<2x8x128xf32>
    %33 = vector.shape_cast %32 : vector<2x8x128xf32> to vector<16x128xf32>
    %34 = arith.addf %29, %33 : vector<16x128xf32>
    %35 = vector.broadcast %5 : vector<1x128xf32> to vector<16x128xf32>
    %36 = arith.addf %34, %35 : vector<16x128xf32>
    %cst_19 = arith.constant 0.000000e+00 : f32
    %37 = vector.broadcast %cst_19 : f32 to vector<16x128xf32>
    %38 = arith.maximumf %36, %37 : vector<16x128xf32>
    %39 = vector.extract_strided_slice %38 {offsets = [0, 0], sizes = [16, 32], strides = [1, 1]} : vector<16x128xf32> to vector<16x32xf32>
    %cst_20 = arith.constant dense<0.000000e+00> : vector<16x128xf32>
    %40 = tpu.matmul %39, %11, %cst_20 {dimension_numbers = #tpu.dot_dimension_numbers<[1], [0], [0], [1], [0, 0, 1, 1], [], []>} : vector<16x32xf32>, vector<32x128xf32>, vector<16x128xf32> -> vector<16x128xf32>
    %41 = vector.broadcast %6 : vector<1x128xf32> to vector<16x128xf32>
    %42 = arith.addf %40, %41 : vector<16x128xf32>
    %c0_21 = arith.constant 0 : index
    %43 = memref.load %arg0[%c0_21] : memref<1xf32, #tpu.memory_space<smem>>
    %44 = tpu.iota {dimensions = array<i32: 1>} : vector<16x128xi32>
    %c16_i32 = arith.constant 16 : i32
    %45 = vector.broadcast %c16_i32 : i32 to vector<16x128xi32>
    %46 = arith.cmpi slt, %44, %45 : vector<16x128xi32>
    %cst_22 = arith.constant -1.000000e+30 : f32
    %47 = vector.broadcast %cst_22 : f32 to vector<16x128xf32>
    %48 = arith.select %46, %42, %47 : vector<16x128xi1>, vector<16x128xf32>
    %cst_23 = arith.constant dense<0xFF800000> : vector<16xf32>
    %49 = vector.multi_reduction <maximumf>, %48, %cst_23 [1] : vector<16x128xf32> to vector<16xf32>
    %50 = vector.shape_cast %49 : vector<16xf32> to vector<16x1xf32>
    %51 = vector.broadcast %50 : vector<16x1xf32> to vector<16x128xf32>
    %52 = arith.subf %48, %51 : vector<16x128xf32>
    %53 = vector.broadcast %43 : f32 to vector<16x128xf32>
    %54 = arith.mulf %52, %53 : vector<16x128xf32>
    %55 = math.exp %54 : vector<16x128xf32>
    %cst_24 = arith.constant dense<0.000000e+00> : vector<16xf32>
    %56 = vector.multi_reduction <add>, %55, %cst_24 [1] : vector<16x128xf32> to vector<16xf32>
    %57 = vector.shape_cast %56 : vector<16xf32> to vector<16x1xf32>
    %58 = tpu.reciprocal %57 {approx = true} : vector<16x1xf32> -> vector<16x1xf32>
    %59 = arith.mulf %57, %58 : vector<16x1xf32>
    %cst_25 = arith.constant 2.000000e+00 : f32
    %60 = vector.broadcast %cst_25 : f32 to vector<16x1xf32>
    %61 = arith.subf %60, %59 : vector<16x1xf32>
    %62 = arith.mulf %58, %61 : vector<16x1xf32>
    %63 = vector.broadcast %62 : vector<16x1xf32> to vector<16x128xf32>
    %64 = arith.mulf %55, %63 : vector<16x128xf32>
    %c0_26 = arith.constant 0 : index
    %c0_27 = arith.constant 0 : index
    %65 = vector.load %arg3[%c0_26, %c0_27] : memref<18x128xf32, #tpu.memory_space<vmem>>, vector<16x128xf32>
    tpu.vector_store %arg3[%c0_26, %c0_27], %64 {strides = array<i32>} : memref<18x128xf32, #tpu.memory_space<vmem>>, vector<16x128xf32>,
    %cst_28 = arith.constant 0.000000e+00 : f32
    %66 = vector.broadcast %cst_28 : f32 to vector<2x104xf32>
    %67 = tpu.concatenate %21, %22, %27, %66 in 1 : vector<2x8xf32>, vector<2x8xf32>, vector<2x8xf32>, vector<2x104xf32> -> vector<2x128xf32>
    %c16_29 = arith.constant 16 : index
    %c0_30 = arith.constant 0 : index
    %68 = vector.load %arg3[%c16_29, %c0_30] : memref<18x128xf32, #tpu.memory_space<vmem>>, vector<2x128xf32>
    tpu.vector_store %arg3[%c16_29, %c0_30], %67 {strides = array<i32>} : memref<18x128xf32, #tpu.memory_space<vmem>>, vector<2x128xf32>,
    return
  }
}

</mosaic_0001>

<bundles_post_ra>
// kernel: vae_forward.1
= control target key start
LH: loop header
LB: loop body
LE: loop exit
PB: predicated region body
PF: predicated region fallthrough
CT: control target
= control target key end

     0   :  { %9 = vsyncpa [#allocation4], 0  ;;  %s753_s12 = smov [#allocation3]   ;;  %s836_s0 = inlined_call_operand.<no memory space> [shape: f32[1], index: 0, kind: input, shape index: {}]   ;;  %s837_s1 = inlined_call_operand.vmem [shape: f32[32,128], index: 1, kind: input, shape index: {}]   ;;  %s838_s2 = inlined_call_operand.hbm [shape: f32[232,128], index: 2, kind: input, shape index: {}]   ;;  %s839_s3 = inlined_call_operand.vmem [shape: f32[18,128], index: 3, kind: output, shape index: {}]  }
   0x1   :  { %s19_s13 = sshll.u32 %s753_s12, 4  ;;  %s729_s16 = scalar_lea.hbm %s838_s2, 3712  ;;  %s20_s13 = int_to_ptr.vmem [resolvable:$true] %s19_s13 }
   0x2   :  { %p730_p0 = scmp.ne.s32.totalorder %s838_s2, %s729_s16  ;;  %p733_p1 = scmp.lt.u32.totalorder %s729_s16, %s838_s2 }
   0x4   :  { %p735_p2 = pnand %p733_p1, %p730_p0 }
   0x6   :  { %738 = shalt.err (!%p735_p2)
}
   0x7   :  { %s739_s21 = scalar_lea.vmem %s20_s13, 3712  ;;  %p744_p4 = scmp.lt.s32.totalorder %s20_s13, %s20_s13 }
   0x8   :  { %p740_p3 = scmp.ne.s32.totalorder %s20_s13, %s739_s21  ;;  %p745_p5 = scmp.lt.s32.totalorder %s739_s21, %s739_s21 }
   0xa   :  { %p746_p6 = por %p745_p5, %p744_p4 }
   0xc   :  { %p747_p7 = pnand %p746_p6, %p740_p3 }
   0xe   :  { %750 = shalt.err (!%p747_p7)
}
   0xf   :  { %s754_s22 = smov 128   ;;  %s755_s23 = smov 8  }
  0x10   :  { %25 = dma.hbm_to_vmem [thread:$0]  %s838_s2, 3712, %s20_s13, [#allocation4], %s754_s22, %s754_s22, %s755_s23  }
  0x11   :  { %751 = dma.done.wait [#allocation4], 3712  }
  0x12   :  { %752 = vsyncadd [#allocation4], 4294963584  ;;  %v756_v0 = vmov 0.0|0.0   ;;  %vm757_vm0 = vmmov 0   ;;  %v758_v1 = vmov 0.0   ;;  %v37_v2 = vld [vmem:[#allocation3 + $0x10] sm:$0xff]  ;;  %v304_v63 = vlaneseq }
  0x13   :  { %668 = vmatprep.subr.bf16.mxu0 %v756_v0  ;;  %631 = vmatprep.mubr.msk.f32.mxu0 %vm757_vm0, %v758_v1  ;;  %v38_v3 = vld [vmem:[#allocation3 + $0x18] sm:$0xff]  ;;  %v39_v4 = vld [vmem:[#allocation3 + $0x20] sm:$0xff]  ;;  %v40_v6 = vld [vmem:[#allocation3 + $0x28] sm:$0xff]  ;;  %vm143_vm1 = vcmask 261120   ;;  %s759_s27 = smov 120   ;;  %vm226_vm2 = vcmask 64512  }
  0x14   :  { %692 = vmatprep.subr.bf16.mxu1 %v756_v0  ;;  %642 = vmatprep.mubr.msk.f32.mxu1 %vm757_vm0, %v758_v1  ;;  %v669_v5 = vpack.c.bf16 %v38_v3, %v37_v2  ;;  %v672_v7 = vpack.c.bf16 %v40_v6, %v39_v4  ;;  %v41_v8 = vld [vmem:[#allocation3 + $0x30] sm:$0xff]  ;;  %v42_v9 = vld [vmem:[#allocation3 + $0x38] sm:$0xff]  ;;  %v43_v14 = vld [vmem:[#allocation3 + $0x40] sm:$0xff]  ;;  %vm333_vm3 = vcmask 130048   ;;  %v760_v61 = vmov 1966171168  }
  0x15   :  { %v53_v10 = vld [vmem:[#allocation3 + $0x90] sm:$0xff]  ;;  %v54_v11 = vld [vmem:[#allocation3 + $0x98] sm:$0xff]  ;;  %v675_v12 = vpack.c.bf16 %v42_v9, %v41_v8  ;;  %v44_v15 = vld [vmem:[#allocation3 + $0x48] sm:$0xff]  ;;  %v302_v62 = vunpack.c.l.s4 %v760_v61  ;;  %s761_s8 = smov 16   ;;  %vm547_vm5 = vcmask 195584  }
  0x16   :  { %670 = vmatpush3.bf16.msra.mxu0 %v669_v5  ;;  %v693_v13 = vpack.c.bf16 %v54_v11, %v53_v10  ;;  %v678_v16 = vpack.c.bf16 %v44_v15, %v43_v14  ;;  %v45_v17 = vld [vmem:[#allocation3 + $0x50] sm:$0xff]  ;;  %v46_v18 = vld [vmem:[#allocation3 + $0x58] sm:$0xff]  ;;  %v47_v20 = vld [vmem:[#allocation3 + $0x60] sm:$0xff] }
  0x17   :  { %671 = vmatprep.subr.bf16.mxu0 %v756_v0  ;;  %v681_v19 = vpack.c.bf16 %v46_v18, %v45_v17  ;;  %v48_v21 = vld [vmem:[#allocation3 + $0x68] sm:$0xff]  ;;  %v49_v23 = vld [vmem:[#allocation3 + $0x70] sm:$0xff]  ;;  %v50_v24 = vld [vmem:[#allocation3 + $0x78] sm:$0xff] }
  0x18   :  { %694 = vmatpush3.bf16.msra.mxu1 %v693_v13  ;;  %v684_v22 = vpack.c.bf16 %v48_v21, %v47_v20  ;;  %v687_v25 = vpack.c.bf16 %v50_v24, %v49_v23  ;;  %v51_v26 = vld [vmem:[#allocation3 + $0x80] sm:$0xff]  ;;  %v52_v27 = vld [vmem:[#allocation3 + $0x88] sm:$0xff]  ;;  %v57_v44 = vld [vmem:[#allocation3 + $0xb0] sm:$0xff]  ;;  %v510_v21 = vand.u32 127, %v304_v63 }
  0x19   :  { %695 = vmatprep.subr.bf16.mxu1 %v756_v0  ;;  %v690_v28 = vpack.c.bf16 %v52_v27, %v51_v26  ;;  %v29_v29 = vld [vmem:[%s837_s1] sm:$0x3]  ;;  %v56_v31 = vld [vmem:[#allocation3 + $0xa8] sm:$0xff]  ;;  %v58_v45 = vld [vmem:[#allocation3 + $0xb8] sm:$0xff] }
  0x1a   :  { %673 = vmatpush3.bf16.msra.mxu0 %v672_v7  ;;  %v55_v30 = vld [vmem:[#allocation3 + $0xa0] sm:$0xff]  ;;  %v32_v49 = vld [vmem:[%s837_s1 + $0x18] sm:$0x3]  ;;  %v30_v53 = vld [vmem:[%s837_s1 + $0x8] sm:$0xff]  ;;  %vm511_vm4 = vcmp.lt.s32.totalorder %v510_v21, 16 }
  0x1b   :  { %674 = vmatprep.subr.bf16.mxu0 %v756_v0  ;;  %v696_v32 = vpack.c.bf16 %v56_v31, %v55_v30  ;;  %v555_v33 = vld [vmem:[#allocation3] ss:$0 sm:$0xff]  ;;  %v556_v38 = vld [vmem:[#allocation3 + $0x1] ss:$0 sm:$0xff]  ;;  %v31_v54 = vld [vmem:[%s837_s1 + $0x10] sm:$0xff] }
  0x1c   :  { %v59_v46 = vld [vmem:[#allocation3 + $0xc0] sm:$0xff]  ;;  %v60_v55 = vld [vmem:[#allocation3 + $0xc8] sm:$0xff]  ;;  %v61_v56 = vld [vmem:[#allocation3 + $0xd0] sm:$0xff] }
  0x1d   :  { %697 = vmatpush3.bf16.msra.mxu1 %v696_v32  ;;  %v698_v47 = vpack.c.bf16 %v59_v46, %v58_v45  ;;  %v702_v57 = vpack.c.bf16 %v61_v56, %v60_v55  ;;  %v62_v58 = vld [vmem:[#allocation3 + $0xd8] sm:$0xff]  ;;  %v63_v59 = vld [vmem:[#allocation3 + $0xe0] sm:$0xff]  ;;  %v561_v13 = vld [vmem:[#allocation3 + $0x8] ss:$0 sm:$0xff] }
  0x1e   :  { %676 = vmatpush3.bf16.msra.mxu0 %v675_v12  ;;  %645 = vmatprep.subr.mxu1 %v758_v1  ;;  %v706_v60 = vpack.c.bf16 %v63_v59, %v62_v58 }
  0x1f   :  { %677 = vmatprep.subr.bf16.mxu0 %v756_v0 }
  0x22   :  { %679 = vmatpush3.bf16.msra.mxu0 %v678_v16 }
  0x23   :  { %680 = vmatprep.subr.bf16.mxu0 %v756_v0 }
  0x26   :  { %682 = vmatpush3.bf16.msra.mxu0 %v681_v19 }
  0x27   :  { %683 = vmatprep.subr.bf16.mxu0 %v756_v0 }
  0x2a   :  { %685 = vmatpush3.bf16.msra.mxu0 %v684_v22  ;;  %v562_v22 = vld [vmem:[#allocation3 + $0x9] ss:$0 sm:$0xff] }
  0x2b   :  { %686 = vmatprep.subr.bf16.mxu0 %v756_v0 }
  0x2e   :  { %688 = vmatpush3.bf16.msra.mxu0 %v687_v25 }
  0x2f   :  { %689 = vmatprep.subr.bf16.mxu0 %v756_v0  ;;  %v303_v0 = vunpack.c.0.s8 %v302_v62 }
  0x32   :  { %691 = vmatpush3.bf16.msra.mxu0 %v690_v28 }
  0x35   :  { %632 = vmatmul.mubr.f32.vlgmr.msra.gmra.mrb[0].mxu0 %v29_v29  ;;  %v520_v29 = vstv %s836_s0 }
 0x108   :  { %v134_v34 = vpop.f32.mrb[0].mxu0 }
 0x109   :  { %v135_v35 = vadd.f32 %v555_v33, %v134_v34  ;;  %v633_v36 = vpop.f32.mrb[1].mxu0 }
 0x10b   :  { %v138_v37 = vmax.f32 %v135_v35, 0.0 }
 0x10d   :  { %643 = vmatmul.mubr.msk.f32.vlgmr.msra.gmra.mrb[0].mxu1 %vm143_vm1, %v138_v37 }
 0x10e   :  { %647 = vmatprep.mubr.msk.f32.mxu1 %vm757_vm0, %v758_v1  ;;  %646 = vmatpush3.msra.mxu1 %v57_v44  ;;  %v305_v1 = vshrl.u32 %v304_v63, 7 }
 0x10f   :  { %699 = vmatprep.subr.bf16.mxu1 %v698_v47 }
 0x110   :  { %v306_v2 = vsub.s32 %v303_v0, %v305_v1  ;;  %v325_v6 = vsub.s32 0, %v305_v1 }
 0x1e0   :  { %v213_v39 = vpop.f32.mrb[0].mxu1 }
 0x1e1   :  { %v801_v40 = vadd.f32 %v556_v38, %v213_v39  ;;  %v644_v41 = vpop.f32.mrb[1].mxu1 }
 0x1e3   :  { %v217_v42 = vmul.f32 0.5, %v801_v40 }
 0x1e5   :  { %v218_v43 = vmul.f32 1.442695, %v217_v42 }
 0x1e7   :  { %719 = vpow2.f32 %v218_v43 }
 0x1f1   :  { %v720_v48 = vpop.eup %719 }
 0x1f2   :  { %221 = vrot.lane.b32.xlu0 %v720_v48, %s759_s27 }
 0x264   :  { %v222_v50 = vpop.permute.xlu0 %221 }
 0x265   :  { %v224_v51 = vmul.f32 %v222_v50, %v32_v49 }
 0x267   :  { %v808_v52 = vadd.f32 %v224_v51, %v801_v40 }
 0x269   :  { %648 = vmatmul.mubr.msk.f32.vlgmr.msra.gmra.mrb[2].mxu1 %vm226_vm2, %v808_v52 }
 0x26a   :  { %701 = vmatpush3.bf16.msra.mxu1 %v698_v47  ;;  %654 = vmatprep.mubr.msk.f32.mxu1 %vm333_vm3, %v30_v53 }
 0x26b   :  { %703 = vmatprep.subr.bf16.mxu1 %v702_v57 }
 0x26d   :  { %655 = vmatmul.mubr.msk.f32.vlgmr.msra.gmra.mrb[4].mxu1 %vm333_vm3, %v31_v54 }
 0x26e   :  { %705 = vmatpush3.bf16.msra.mxu1 %v702_v57 }
 0x26f   :  { %707 = vmatprep.subr.bf16.mxu1 %v706_v60 }
 0x272   :  { %709 = vmatpush3.bf16.msra.mxu1 %v706_v60 }
 0x33c   :  { %v296_v3 = vpop.f32.mrb[2].mxu1 }
 0x33d   :  { %v307_v4 = vrot.slane %v296_v3, %v306_v2  ;;  %v649_v5 = vpop.f32.mrb[3].mxu1 }
 0x33f   :  { %v308_v7 = vcombine.high %v307_v4, %v307_v4  ;;  %v315_v8 = vrot.slane %v307_v4, %v306_v2 }
 0x340   :  { %v656_v9 = vpop.f32.mrb[4].mxu1 }
 0x341   :  { %v322_v10 = vrot.slane %v308_v7, %v306_v2  ;;  %v326_v11 = vrot.slane %v315_v8, %v325_v6  ;;  %v406_v12 = vpop.f32.mrb[5].mxu1 }
 0x343   :  { %v330_v14 = vrot.slane %v322_v10, %v325_v6  ;;  %v407_v15 = vadd.f32 %v406_v12, %v326_v11 }
 0x345   :  { %v412_v16 = vadd.f32 %v656_v9, %v330_v14  ;;  %v419_v17 = vadd.f32 %v561_v13, %v407_v15 }
 0x347   :  { %v420_v18 = vadd.f32 %v561_v13, %v412_v16  ;;  %v421_v19 = vmax.f32 %v419_v17, 0.0 }
 0x349   :  { %v422_v20 = vmax.f32 %v420_v18, 0.0  ;;  %665 = vmatprep.mubr.msk.f32.mxu1 %vm143_vm1, %v421_v19 }
 0x34b   :  { %666 = vmatmul.mubr.msk.f32.vlgmr.msra.gmra.mrb[6].mxu1 %vm143_vm1, %v422_v20 }
 0x41e   :  { %v667_v23 = vpop.f32.mrb[6].mxu1 }
 0x41f   :  { %v505_v24 = vadd.f32 %v667_v23, %v562_v22  ;;  %v499_v25 = vpop.f32.mrb[7].mxu1 }
 0x420   :  { %v500_v26 = vadd.f32 %v562_v22, %v499_v25 }
 0x421   :  { %v513_v27 = vsel %vm511_vm4, %v505_v24, -1e+30 }
 0x422   :  { %516 = vmax.xlane.f32.xlu1 %v513_v27  ;;  %v512_v28 = vsel %vm511_vm4, %v500_v26, -1e+30 }
 0x423   :  { %514 = vmax.xlane.f32.xlu0 %v512_v28 }
 0x4af   :  { %v517_v30 = vpop.xlane.xlu1 %516 }
 0x4b0   :  { %v519_v31 = vsub.f32 %v513_v27, %v517_v30  ;;  %v515_v32 = vpop.xlane.xlu0 %514 }
 0x4b1   :  { %v518_v33 = vsub.f32 %v512_v28, %v515_v32 }
 0x4b2   :  { %v522_v34 = vmul.f32 %v520_v29, %v519_v31 }
 0x4b3   :  { %v521_v35 = vmul.f32 %v520_v29, %v518_v33 }
 0x4b4   :  { %v525_v36 = vmul.f32 1.442695, %v522_v34 }
 0x4b5   :  { %v523_v37 = vmul.f32 1.442695, %v521_v35 }
 0x4b6   :  { %721 = vpow2.f32 %v525_v36 }
 0x4b7   :  { %723 = vpow2.f32 %v523_v37 }
 0x4c0   :  { %v722_v38 = vpop.eup %721 }
 0x4c1   :  { %529 = vadd.xlane.f32.xlu1 %v722_v38  ;;  %v724_v39 = vpop.eup %723 }
 0x4c5   :  { %527 = vadd.xlane.f32.xlu1 %v724_v39 }
 0x4d6   :  { %543 = vrot.lane.b32.xlu1 %v808_v52, %s761_s8 }
 0x54e   :  { %v530_v41 = vpop.xlane.xlu1 %529 }
 0x54f   :  { %725 = vrcp.f32 %v530_v41 }
 0x552   :  { %v528_v42 = vpop.xlane.xlu1 %527 }
 0x553   :  { %727 = vrcp.f32 %v528_v42 }
 0x556   :  { %v544_v43 = vpop.permute.xlu1 %543 }
 0x557   :  { %v546_v44 = vsel %vm333_vm3, %v801_v40, %v544_v43 }
 0x558   :  { %v548_v45 = vsel %vm547_vm5, %v546_v44, 0.0 }
 0x559   :  { %v726_v46 = vpop.eup %725  ;;  %549 = vst [vmem:[%s839_s3 + $0x10] sm:$0x3] %v548_v45 }
 0x55a   :  { %v534_v47 = vmul.f32 %v726_v46, %v530_v41 }
 0x55c   :  { %v536_v48 = vsub.f32 2.0, %v534_v47 }
 0x55d   :  { %v728_v49 = vpop.eup %727 }
 0x55e   :  { %v538_v50 = vmul.f32 %v726_v46, %v536_v48  ;;  %v533_v51 = vmul.f32 %v728_v49, %v528_v42 }
 0x560   :  { %v540_v52 = vmul.f32 %v722_v38, %v538_v50  ;;  %v535_v53 = vsub.f32 2.0, %v533_v51 }
 0x562   :  { %542 = vst [vmem:[%s839_s3 + $0x8] sm:$0xff] %v540_v52  ;;  %v537_v54 = vmul.f32 %v728_v49, %v535_v53 }
 0x564   :  { %v539_v55 = vmul.f32 %v724_v39, %v537_v54 }
 0x566   :  { %541 = vst [vmem:[%s839_s3] sm:$0xff] %v539_v55 }
 0x567   :  { %554 = vsyncpa [#allocation4], 1 }

</bundles_post_ra>
